<compile_context>
chip_gen: v6e
topology: v6e:2x2x1
jax: 0.10.0
libtpu: 0.0.40
codegen_flags: <defaults>
</compile_context>

<pallas_src>
import jax
import jax.numpy as jnp
from jax import lax
from jax.experimental import pallas as pl
from jax.experimental.pallas import tpu as pltpu


def _gelu_tanh(x):
    # tanh-approximation GELU (matches ttl.tensor.gelu fast path); tanh -> EUP.
    c = 0.7978845608028654  # sqrt(2/pi)
    return 0.5 * x * (1.0 + jnp.tanh(c * (x + 0.044715 * x * x * x)))


def _round_up(x, m):
    return ((x + m - 1) // m) * m


def ffn_kernel(x_ref, w1_ref, b1_ref, w2_ref, b2_ref, o_ref, acc_ref):
    """Grid = (m_tiles, f_tiles); f (ffn chunks) is the accumulation axis.

    x_ref : (tile_m, hidden)        bf16   - same block across the f axis
    w1_ref: (tile_f, hidden)        bf16   - W1 slab (native Linear layout)
    b1_ref: (1, tile_f)             bf16
    w2_ref: (hidden, tile_f)        bf16   - W2 slab (native Linear layout)
    b2_ref: (1, hidden)             bf16
    o_ref : (tile_m, hidden)        bf16   - written on the last f chunk
    acc_ref: (tile_m, hidden)       f32 VMEM accumulator
    """
    f = pl.program_id(1)

    @pl.when(f == 0)
    def _init():
        acc_ref[...] = jnp.zeros_like(acc_ref)

    # op13 (chunked): h_chunk = gelu(x @ W1_chunk^T + b1_chunk)
    # Contract last dim of both operands -> MXU "NT" matmul, bf16 in / f32 acc.
    h = lax.dot_general(
        x_ref[...], w1_ref[...],
        dimension_numbers=(((1,), (1,)), ((), ())),
        preferred_element_type=jnp.float32)
    h = h + b1_ref[...].astype(jnp.float32)
    h = _gelu_tanh(h)

    # op14 (chunked): y += h_chunk @ W2_chunk^T   (accumulate over ffn chunks)
    acc_ref[...] += lax.dot_general(
        h.astype(w2_ref.dtype), w2_ref[...],
        dimension_numbers=(((1,), (1,)), ((), ())),
        preferred_element_type=jnp.float32)

    @pl.when(f == pl.num_programs(1) - 1)
    def _finalize():
        o_ref[...] = (acc_ref[...]
                      + b2_ref[...].astype(jnp.float32)).astype(o_ref.dtype)


def tt_feed_forward(activation, ff1_weight, ff1_bias, ff2_weight, ff2_bias,
                    *, tile_m=256, tile_f=512):
    """activation: [B, 1, S, hidden] bf16.
    ff1_weight: [ffn_dim, hidden], ff1_bias: [ffn_dim]
    ff2_weight: [hidden, ffn_dim], ff2_bias: [hidden]
    Returns [B, 1, S, hidden] in activation.dtype."""
    B, one, S, hidden = activation.shape
    ffn_dim = ff1_weight.shape[0]
    M = B * one * S

    x2d = activation.reshape(M, hidden)

    # --- M (row) tiling: large tile, pad so no tail rows are dropped. ---
    tile_m = min(tile_m, _round_up(M, 16))   # >= 16 rows, multiple of 16 (bf16)
    m_pad = _round_up(M, tile_m)
    if m_pad != M:
        x2d = jnp.pad(x2d, ((0, m_pad - M), (0, 0)))

    # --- ffn (intermediate) tiling: stream weight slabs + accumulate. ---
    tile_f = min(tile_f, ffn_dim)
    if ffn_dim % tile_f != 0:
        tile_f = ffn_dim                      # fall back to a single slab

    b1 = ff1_bias.reshape(1, ffn_dim)
    b2 = ff2_bias.reshape(1, hidden)

    grid = (m_pad // tile_m, ffn_dim // tile_f)

    out2d = pl.pallas_call(
        ffn_kernel,
        out_shape=jax.ShapeDtypeStruct((m_pad, hidden), activation.dtype),
        grid_spec=pltpu.PrefetchScalarGridSpec(
            num_scalar_prefetch=0,
            grid=grid,
            in_specs=[
                pl.BlockSpec((tile_m, hidden), lambda i, f: (i, 0)),   # x rows
                pl.BlockSpec((tile_f, hidden), lambda i, f: (f, 0)),   # W1 slab
                pl.BlockSpec((1, tile_f),      lambda i, f: (0, f)),   # b1 slab
                pl.BlockSpec((hidden, tile_f), lambda i, f: (0, f)),   # W2 slab
                pl.BlockSpec((1, hidden),      lambda i, f: (0, 0)),   # b2
            ],
            out_specs=pl.BlockSpec((tile_m, hidden), lambda i, f: (i, 0)),
            scratch_shapes=[pltpu.VMEM((tile_m, hidden), jnp.float32)],
        ),
        compiler_params=pltpu.CompilerParams(
            dimension_semantics=("parallel", "arbitrary")),
    )(x2d, ff1_weight, b1, ff2_weight, b2)

    if m_pad != M:
        out2d = out2d[:M]
    return out2d.reshape(B, one, S, hidden)


def _reference(activation, ff1_weight, ff1_bias, ff2_weight, ff2_bias):
    x = activation.astype(jnp.float32)
    h = jnp.einsum("bish,fh->bisf", x, ff1_weight.astype(jnp.float32))
    h = h + ff1_bias.astype(jnp.float32)
    h = _gelu_tanh(h)
    y = jnp.einsum("bisf,hf->bish", h, ff2_weight.astype(jnp.float32))
    y = y + ff2_bias.astype(jnp.float32)
    return y.astype(activation.dtype)


if __name__ == "__main__":
    # Small shapes consistent with the module: [B, 1, S, hidden], ffn = 4*hidden.
    B, S, hidden = 2, 8, 32
    ffn_dim = 4 * hidden  # 128

    key = jax.random.PRNGKey(0)
    k_act, k_w1, k_b1, k_w2, k_b2 = jax.random.split(key, 5)

    activation = (jax.random.normal(k_act, (B, 1, S, hidden), jnp.float32)
                  * 0.5).astype(jnp.bfloat16)
    ff1_weight = (jax.random.normal(k_w1, (ffn_dim, hidden), jnp.float32)
                  * 0.05).astype(jnp.bfloat16)
    ff1_bias = (jax.random.normal(k_b1, (ffn_dim,), jnp.float32)
                * 0.05).astype(jnp.bfloat16)
    ff2_weight = (jax.random.normal(k_w2, (hidden, ffn_dim), jnp.float32)
                  * 0.05).astype(jnp.bfloat16)
    ff2_bias = (jax.random.normal(k_b2, (hidden,), jnp.float32)
                * 0.05).astype(jnp.bfloat16)

    out = tt_feed_forward(activation, ff1_weight, ff1_bias, ff2_weight, ff2_bias)
    out = jax.block_until_ready(out)

    ref = _reference(activation, ff1_weight, ff1_bias, ff2_weight, ff2_bias)
    err = jnp.max(jnp.abs(out.astype(jnp.float32) - ref.astype(jnp.float32)))
    assert out.shape == (B, 1, S, hidden)
    assert float(err) < 5e-2, f"max abs err {float(err)}"

    print("KERNEL_OK")
</pallas_src>

<mosaic_0001>
module attributes {stable_mosaic.version = 11 : i64} {
  func.func @ffn_kernel(%arg0: i32, %arg1: i32, %arg2: memref<16x32xbf16, #tpu.memory_space<vmem>>, %arg3: memref<128x32xbf16, #tpu.memory_space<vmem>>, %arg4: memref<1x128xbf16, #tpu.memory_space<vmem>>, %arg5: memref<32x128xbf16, #tpu.memory_space<vmem>>, %arg6: memref<1x32xbf16, #tpu.memory_space<vmem>>, %arg7: memref<16x32xbf16, #tpu.memory_space<vmem>>, %arg8: memref<16x32xf32, #tpu.memory_space<vmem>>) attributes {dimension_semantics = [#tpu.dimension_semantics<parallel>, #tpu.dimension_semantics<arbitrary>], iteration_bounds = array<i64: 1, 1>, scalar_prefetch = 0 : i64, scratch_operands = 1 : i64, tpu.core_type = #tpu.core_type<tc>, window_params = [{transform_indices = @transform_0, window_bounds = array<i64: 16, 32>}, {transform_indices = @transform_1, window_bounds = array<i64: 128, 32>}, {transform_indices = @transform_2, window_bounds = array<i64: 1, 128>}, {transform_indices = @transform_3, window_bounds = array<i64: 32, 128>}, {pipeline_mode = #tpu.pipeline_mode<synchronous>, transform_indices = @transform_4, window_bounds = array<i64: 1, 32>}, {transform_indices = @transform_5, window_bounds = array<i64: 16, 32>}]} {
    %c0_i32 = arith.constant 0 : i32
    %0 = arith.cmpi eq, %arg1, %c0_i32 : i32
    %1 = arith.extui %0 : i1 to i32
    %c0_i32_0 = arith.constant 0 : i32
    %2 = arith.cmpi ne, %1, %c0_i32_0 : i32
    scf.if %2 {
      %cst_19 = arith.constant 0.000000e+00 : f32
      %32 = vector.broadcast %cst_19 : f32 to vector<16x32xf32>
      %c0_20 = arith.constant 0 : index
      %c0_21 = arith.constant 0 : index
      %33 = vector.load %arg8[%c0_20, %c0_21] : memref<16x32xf32, #tpu.memory_space<vmem>>, vector<16x32xf32>
      tpu.vector_store %arg8[%c0_20, %c0_21], %32 {strides = array<i32>} : memref<16x32xf32, #tpu.memory_space<vmem>>, vector<16x32xf32>,
    } else {
    }
    %c0 = arith.constant 0 : index
    %c0_1 = arith.constant 0 : index
    %3 = vector.load %arg2[%c0, %c0_1] : memref<16x32xbf16, #tpu.memory_space<vmem>>, vector<16x32xbf16>
    %c0_2 = arith.constant 0 : index
    %c0_3 = arith.constant 0 : index
    %4 = vector.load %arg3[%c0_2, %c0_3] : memref<128x32xbf16, #tpu.memory_space<vmem>>, vector<128x32xbf16>
    %cst = arith.constant dense<0.000000e+00> : vector<16x128xf32>
    %5 = tpu.matmul %3, %4, %cst {dimension_numbers = #tpu.dot_dimension_numbers<[1], [1], [0], [0], [0, 0, 1, 0], [], []>} : vector<16x32xbf16>, vector<128x32xbf16>, vector<16x128xf32> -> vector<16x128xf32>
    %c0_4 = arith.constant 0 : index
    %c0_5 = arith.constant 0 : index
    %6 = vector.load %arg4[%c0_4, %c0_5] : memref<1x128xbf16, #tpu.memory_space<vmem>>, vector<1x128xbf16>
    %7 = arith.extf %6 : vector<1x128xbf16> to vector<1x128xf32>
    %8 = vector.broadcast %7 : vector<1x128xf32> to vector<16x128xf32>
    %9 = arith.addf %5, %8 : vector<16x128xf32>
    %cst_6 = arith.constant 5.000000e-01 : f32
    %10 = vector.broadcast %cst_6 : f32 to vector<16x128xf32>
    %11 = arith.mulf %10, %9 : vector<16x128xf32>
    %cst_7 = arith.constant 4.471500e-02 : f32
    %12 = vector.broadcast %cst_7 : f32 to vector<16x128xf32>
    %13 = arith.mulf %12, %9 : vector<16x128xf32>
    %14 = arith.mulf %13, %9 : vector<16x128xf32>
    %15 = arith.mulf %14, %9 : vector<16x128xf32>
    %16 = arith.addf %9, %15 : vector<16x128xf32>
    %cst_8 = arith.constant 0.797884583 : f32
    %17 = vector.broadcast %cst_8 : f32 to vector<16x128xf32>
    %18 = arith.mulf %17, %16 : vector<16x128xf32>
    %19 = math.tanh %18 : vector<16x128xf32>
    %cst_9 = arith.constant 1.000000e+00 : f32
    %20 = vector.broadcast %cst_9 : f32 to vector<16x128xf32>
    %21 = arith.addf %20, %19 : vector<16x128xf32>
    %22 = arith.mulf %11, %21 : vector<16x128xf32>
    %c0_10 = arith.constant 0 : index
    %c0_11 = arith.constant 0 : index
    %23 = vector.load %arg8[%c0_10, %c0_11] : memref<16x32xf32, #tpu.memory_space<vmem>>, vector<16x32xf32>
    %24 = arith.truncf %22 : vector<16x128xf32> to vector<16x128xbf16>
    %c0_12 = arith.constant 0 : index
    %c0_13 = arith.constant 0 : index
    %25 = vector.load %arg5[%c0_12, %c0_13] : memref<32x128xbf16, #tpu.memory_space<vmem>>, vector<32x128xbf16>
    %cst_14 = arith.constant dense<0.000000e+00> : vector<16x32xf32>
    %26 = tpu.matmul %24, %25, %cst_14 {dimension_numbers = #tpu.dot_dimension_numbers<[1], [1], [0], [0], [0, 0, 1, 0], [], []>} : vector<16x128xbf16>, vector<32x128xbf16>, vector<16x32xf32> -> vector<16x32xf32>
    %27 = arith.addf %23, %26 : vector<16x32xf32>
    %c0_15 = arith.constant 0 : index
    %c0_16 = arith.constant 0 : index
    %28 = vector.load %arg8[%c0_15, %c0_16] : memref<16x32xf32, #tpu.memory_space<vmem>>, vector<16x32xf32>
    tpu.vector_store %arg8[%c0_15, %c0_16], %27 {strides = array<i32>} : memref<16x32xf32, #tpu.memory_space<vmem>>, vector<16x32xf32>,
    %c0_i32_17 = arith.constant 0 : i32
    %29 = arith.cmpi eq, %arg1, %c0_i32_17 : i32
    %30 = arith.extui %29 : i1 to i32
    %c0_i32_18 = arith.constant 0 : i32
    %31 = arith.cmpi ne, %30, %c0_i32_18 : i32
    scf.if %31 {
      %c0_19 = arith.constant 0 : index
      %c0_20 = arith.constant 0 : index
      %32 = vector.load %arg8[%c0_19, %c0_20] : memref<16x32xf32, #tpu.memory_space<vmem>>, vector<16x32xf32>
      %c0_21 = arith.constant 0 : index
      %c0_22 = arith.constant 0 : index
      %33 = vector.load %arg6[%c0_21, %c0_22] : memref<1x32xbf16, #tpu.memory_space<vmem>>, vector<1x32xbf16>
      %34 = arith.extf %33 : vector<1x32xbf16> to vector<1x32xf32>
      %35 = vector.broadcast %34 : vector<1x32xf32> to vector<16x32xf32>
      %36 = arith.addf %32, %35 : vector<16x32xf32>
      %37 = arith.truncf %36 : vector<16x32xf32> to vector<16x32xbf16>
      %c0_23 = arith.constant 0 : index
      %c0_24 = arith.constant 0 : index
      %38 = vector.load %arg7[%c0_23, %c0_24] : memref<16x32xbf16, #tpu.memory_space<vmem>>, vector<16x32xbf16>
      tpu.vector_store %arg7[%c0_23, %c0_24], %37 {strides = array<i32>} : memref<16x32xbf16, #tpu.memory_space<vmem>>, vector<16x32xbf16>,
    } else {
    }
    return
  }
  func.func @transform_0(%arg0: i32, %arg1: i32) -> (i32, i32) {
    %c0_i32 = arith.constant 0 : i32
    %c0_i32_0 = arith.constant 0 : i32
    return %arg0, %c0_i32 : i32, i32
  }
  func.func @transform_1(%arg0: i32, %arg1: i32) -> (i32, i32) {
    %c0_i32 = arith.constant 0 : i32
    %c0_i32_0 = arith.constant 0 : i32
    return %arg1, %c0_i32 : i32, i32
  }
  func.func @transform_2(%arg0: i32, %arg1: i32) -> (i32, i32) {
    %c0_i32 = arith.constant 0 : i32
    %c0_i32_0 = arith.constant 0 : i32
    return %c0_i32, %arg1 : i32, i32
  }
  func.func @transform_3(%arg0: i32, %arg1: i32) -> (i32, i32) {
    %c0_i32 = arith.constant 0 : i32
    %c0_i32_0 = arith.constant 0 : i32
    return %c0_i32, %arg1 : i32, i32
  }
  func.func @transform_4(%arg0: i32, %arg1: i32) -> (i32, i32) {
    %c0_i32 = arith.constant 0 : i32
    %c0_i32_0 = arith.constant 0 : i32
    %c0_i32_1 = arith.constant 0 : i32
    return %c0_i32, %c0_i32_0 : i32, i32
  }
  func.func @transform_5(%arg0: i32, %arg1: i32) -> (i32, i32) {
    %c0_i32 = arith.constant 0 : i32
    %c0_i32_0 = arith.constant 0 : i32
    return %arg0, %c0_i32 : i32, i32
  }
}

</mosaic_0001>

<bundles_post_ra>
// kernel: tpu_custom_call.1
= control target key start
LH: loop header
LB: loop body
LE: loop exit
PB: predicated region body
PF: predicated region fallthrough
CT: control target
= control target key end

     0   :  { %vm26_vm0 = vcmask 261120   ;;  %v387_v0 = vmov 0.0   ;;  %vm388_vm1 = vmmov 0   ;;  %s477_s0 = inlined_call_operand.vmem [shape: bf16[16,32], index: 0, kind: input, shape index: {}]   ;;  %s478_s1 = inlined_call_operand.vmem [shape: bf16[128,32], index: 1, kind: input, shape index: {}]   ;;  %s479_s2 = inlined_call_operand.vmem [shape: bf16[1,128], index: 2, kind: input, shape index: {}]   ;;  %s480_s3 = inlined_call_operand.vmem [shape: bf16[32,128], index: 3, kind: input, shape index: {}]   ;;  %s481_s4 = inlined_call_operand.vmem [shape: bf16[1,32], index: 4, kind: input, shape index: {}]   ;;  %s482_s5 = inlined_call_operand.hbm [shape: bf16[16,32], index: 5, kind: output, shape index: {}]  }
   0x1   :  { %317 = vmatprep.subr.bf16.mxu0 %v387_v0  ;;  %v350_v1 = vld [vmem:[%s478_s1 + $0x38] sm:$0xff]   ;;  %27 = vst.msk [vmem:[#allocation2] sm:$0xff] %vm26_vm0, %v387_v0  ;;  %28 = vst.msk [vmem:[#allocation2 + $0x8] sm:$0xff] %vm26_vm0, %v387_v0  ;;  %337 = vmatprep.subr.bf16.mxu1 %v387_v0  ;;  %v351_v3 = vld [vmem:[%s478_s1 + $0x30] sm:$0xff]  }
   0x2   :  { %333 = vmatprep.mubr.msk.bf16.mxu0 %vm388_vm1, %v387_v0  ;;  %341 = vmatprep.mubr.msk.bf16.mxu1 %vm388_vm1, %v387_v0  ;;  %v124_v2 = vsel %vm26_vm0, %v350_v1, 0  ;;  %v121_v4 = vsel %vm26_vm0, %v351_v3, 0 }
   0x3   :  { %318 = vmatpush3.bf16.xpose.msra.mxu0 %v124_v2 }
   0x4   :  { %319 = vmatprep.subr.bf16.mxu0 %v387_v0 }
   0x5   :  { %10 = vsyncpa [#allocation4], 0  ;;  %v352_v5 = vld [vmem:[%s478_s1 + $0x28] sm:$0xff]   ;;  %v353_v7 = vld [vmem:[%s478_s1 + $0x20] sm:$0xff]   ;;  %v49_v20 = vlaneseq  ;;  %vm270_vm2 = vcmask 257024  }
   0x6   :  { %v118_v6 = vsel %vm26_vm0, %v352_v5, 0  ;;  %v115_v8 = vsel %vm26_vm0, %v353_v7, 0  ;;  %v354_v9 = vld [vmem:[%s478_s1 + $0x18] sm:$0xff]   ;;  %v355_v11 = vld [vmem:[%s478_s1 + $0x10] sm:$0xff]   ;;  %v356_v13 = vld [vmem:[%s478_s1 + $0x8] sm:$0xff]  }
   0x7   :  { %v112_v10 = vsel %vm26_vm0, %v354_v9, 0  ;;  %v109_v12 = vsel %vm26_vm0, %v355_v11, 0  ;;  %v106_v14 = vsel %vm26_vm0, %v356_v13, 0  ;;  %v357_v15 = vld [vmem:[%s478_s1] sm:$0xff]   ;;  %v359_v18 = vld [vmem:[%s480_s3 + $0x8] sm:$0xff]   ;;  %v50_v21 = vshrl.u32 %v49_v20, 7 }
   0x8   :  { %v103_v16 = vsel %vm26_vm0, %v357_v15, 0  ;;  %v358_v17 = vld [vmem:[%s477_s0] sm:$0xff]   ;;  %338 = vmatpush3.bf16.xpose.msra.mxu1 %v359_v18  ;;  %v186_v56 = vld [vmem:[#allocation2 + $0x8] sm:$0xff] }
   0x9   :  { %339 = vmatprep.subr.bf16.mxu1 %v387_v0  ;;  %v360_v19 = vld [vmem:[%s480_s3] sm:$0xff]   ;;  %v51_v24 = vsub.s32 0, %v50_v21  ;;  %s389_s3 = smov [#allocation3]  }
   0xa   :  { %v47_v22 = vld [vmem:[%s479_s2] sm:$0x1]  ;;  %s278_s16 = sshll.u32 %s389_s3, 4  ;;  %s279_s16 = int_to_ptr.vmem [resolvable:$true] %s278_s16 }
   0xb   :  { %320 = vmatpush3.bf16.xpose.msra.mxu0 %v121_v4  ;;  %v48_v23 = vunpack.c.l.bf16 %v47_v22  ;;  %v185_v51 = vld [vmem:[#allocation2] sm:$0xff]  ;;  %p370_p1 = scmp.lt.s32.totalorder %s279_s16, %s279_s16 }
   0xc   :  { %321 = vmatprep.subr.bf16.mxu0 %v387_v0  ;;  %v254_v52 = vld [vmem:[%s481_s4] sm:$0x1]  ;;  %s365_s4 = scalar_lea.vmem %s279_s16, 128 }
   0xd   :  { %v52_v25 = vrot.slane %v48_v23, %v51_v24  ;;  %v255_v57 = vunpack.c.l.bf16 %v254_v52  ;;  %p366_p0 = scmp.ne.s32.totalorder %s279_s16, %s365_s4  ;;  %p371_p2 = scmp.lt.s32.totalorder %s365_s4, %s365_s4 }
   0xf   :  { %v259_v61 = vrot.slane %v255_v57, %v51_v24  ;;  %p372_p3 = por %p371_p2, %p370_p1 }
  0x10   :  { %340 = vmatpush3.bf16.xpose.msra.mxu1 %v360_v19 }
  0x11   :  { %p373_p4 = pnand %p372_p3, %p366_p0 }
  0x13   :  { %322 = vmatpush3.bf16.xpose.msra.mxu0 %v118_v6 }
  0x14   :  { %323 = vmatprep.subr.bf16.mxu0 %v387_v0 }
  0x1b   :  { %324 = vmatpush3.bf16.xpose.msra.mxu0 %v115_v8 }
  0x1c   :  { %325 = vmatprep.subr.bf16.mxu0 %v387_v0 }
  0x23   :  { %326 = vmatpush3.bf16.xpose.msra.mxu0 %v112_v10 }
  0x24   :  { %327 = vmatprep.subr.bf16.mxu0 %v387_v0 }
  0x2b   :  { %328 = vmatpush3.bf16.xpose.msra.mxu0 %v109_v12 }
  0x2c   :  { %329 = vmatprep.subr.bf16.mxu0 %v387_v0 }
  0x33   :  { %330 = vmatpush3.bf16.xpose.msra.mxu0 %v106_v14 }
  0x34   :  { %331 = vmatprep.subr.bf16.mxu0 %v387_v0 }
  0x3b   :  { %332 = vmatpush3.bf16.xpose.msra.mxu0 %v103_v16 }
  0x42   :  { %334 = vmatmul.mubr.msk.bf16.vlgmr.msra.gmra.mxu0 %vm26_vm0, %v358_v17 }
 0x102   :  { %v160_v26 = vpop.f32.mrf.mxu0 }
 0x103   :  { %v161_v27 = vadd.f32 %v160_v26, %v52_v25 }
 0x104   :  { %v335_v28 = vpop.f32.mrf.mxu0 }
 0x105   :  { %v169_v29 = vmul.f32 0.044715, %v161_v27  ;;  %v167_v45 = vmul.f32 0.5, %v161_v27 }
 0x106   :  { %v163_v30 = vpop.f32.mrf.mxu0 }
 0x107   :  { %v171_v31 = vmul.f32 %v169_v29, %v161_v27  ;;  %v164_v32 = vadd.f32 %v163_v30, %v52_v25 }
 0x108   :  { %v336_v33 = vpop.f32.mrf.mxu0 }
 0x109   :  { %v173_v34 = vmul.f32 %v171_v31, %v161_v27  ;;  %v170_v35 = vmul.f32 0.044715, %v164_v32  ;;  %v168_v46 = vmul.f32 0.5, %v164_v32 }
 0x10b   :  { %v172_v36 = vmul.f32 %v170_v35, %v164_v32  ;;  %v175_v37 = vadd.f32 %v173_v34, %v161_v27 }
 0x10d   :  { %v174_v38 = vmul.f32 %v172_v36, %v164_v32  ;;  %v177_v39 = vmul.f32 0.7978846, %v175_v37 }
 0x10f   :  { %v176_v40 = vadd.f32 %v174_v38, %v164_v32  ;;  %361 = vtanh.f32 %v177_v39 }
 0x111   :  { %v178_v41 = vmul.f32 0.7978846, %v176_v40 }
 0x113   :  { %363 = vtanh.f32 %v178_v41 }
 0x11c   :  { %v362_v42 = vpop.eup %361 }
 0x11d   :  { %v181_v43 = vadd.f32 1.0, %v362_v42 }
 0x11f   :  { %v183_v48 = vmul.f32 %v181_v43, %v167_v45 }
 0x120   :  { %v364_v44 = vpop.eup %363 }
 0x121   :  { %v182_v47 = vadd.f32 1.0, %v364_v44 }
 0x123   :  { %v184_v49 = vmul.f32 %v182_v47, %v168_v46 }
 0x125   :  { %v187_v50 = vpack.c.bf16 %v184_v49, %v183_v48 }
 0x127   :  { %342 = vmatmul.mubr.bf16.vlgmr.msra.gmra.mxu1 %v187_v50 }
 0x1e7   :  { %v238_v53 = vpop.f32.mrf.mxu1 }
 0x1e8   :  { %v245_v54 = vadd.f32 %v238_v53, %v185_v51 }
 0x1e9   :  { %v343_v55 = vpop.f32.mrf.mxu1 }
 0x1ea   :  { %247 = vst.msk [vmem:[#allocation2] sm:$0xff] %vm26_vm0, %v245_v54 }
 0x1eb   :  { %v241_v58 = vpop.f32.mrf.mxu1 }
 0x1ec   :  { %v246_v59 = vadd.f32 %v241_v58, %v186_v56 }
 0x1ed   :  { %v344_v60 = vpop.f32.mrf.mxu1 }
 0x1ee   :  { %248 = vst.msk [vmem:[#allocation2 + $0x8] sm:$0xff] %vm26_vm0, %v246_v59 }
 0x1f1   :  { %v252_v62 = vld [vmem:[#allocation2] sm:$0xff] }
 0x1f2   :  { %v260_v63 = vadd.f32 %v259_v61, %v252_v62 }
 0x1f4   :  { %v303_v0 = vpack.c.bf16 %v260_v63, %v260_v63 }
 0x1f5   :  { %v253_v1 = vld [vmem:[#allocation2 + $0x8] sm:$0xff] }
 0x1f6   :  { %v261_v2 = vadd.f32 %v259_v61, %v253_v1  ;;  %271 = vst.msk [vmem:[#allocation3] sm:$0xf] %vm270_vm2, %v303_v0 }
 0x1f8   :  { %v304_v3 = vpack.c.bf16 %v261_v2, %v261_v2 }
 0x1fa   :  { %272 = vst.msk [vmem:[#allocation3 + $0x4] sm:$0xf] %vm270_vm2, %v304_v3 }
 0x1fb   :  { %376 = shalt.err (!%p373_p4)
}
 0x1fc   :  { %s390_s17 = smov 64   ;;  %s391_s18 = smov 4  }
 0x1fd   :  { %284 = dma.vmem_to_hbm [thread:$0]  %s279_s16, 128, %s482_s5, [#allocation4], %s390_s17, %s390_s17, %s391_s18  }
 0x1fe   :  { %385 = dma.done.wait [#allocation4], 128  }
 0x1ff   :  { %386 = vsyncadd [#allocation4], 4294967168 }
 0x200   :  { %288 = vsyncpa [#allocation4], 1 }

</bundles_post_ra>
